<compile_context>
chip_gen: v6e
topology: v6e:2x2x1
jax: 0.10.0
libtpu: 0.0.40
codegen_flags: <defaults>
</compile_context>

<pallas_src>
import jax
import jax.numpy as jnp
from jax import lax
from jax.experimental import pallas as pl
from jax.experimental.pallas import tpu as pltpu

_LANES = 128
_CHUNK_ROWS = 256                 # strip size inside a block; multiple of 32 -> aligned for f32/bf16/i8
_TARGET_BLOCK_BYTES = 4 << 20     # ~4 MiB per input block (dtype-aware row count)
_SMALL_INPUT_BYTES = 512 << 10    # below this, XLA's fused reduction wins over pallas fixed cost


def _num_core_splits() -> int:
    """2 row-range splits on dual-TensorCore chips (v7x), else 1."""
    try:
        kind = jax.devices()[0].device_kind.lower()
    except Exception:
        return 1
    return 2 if "v7" in kind else 1


def _mse_partial_kernel(a_ref, b_ref, out_ref):
    """Accumulate per-(sublane, lane) partial sums of (a - b)^2 for this core.

    a_ref, b_ref : (tile_rows, 128) input blocks in their original dtype.
    out_ref      : (8, 128) f32 block; its index_map is constant along the
                   reduction axis, so it stays VMEM-resident and acts as the
                   accumulator.  No tile-sized scratch, no in-kernel cross-lane
                   reduce; the wrapper sums the partials.
    """
    i = pl.program_id(1)

    @pl.when(i == 0)
    def _init():
        out_ref[...] = jnp.zeros_like(out_ref)

    n_chunks = a_ref.shape[0] // _CHUNK_ROWS

    def body(c, acc):
        r = pl.multiple_of(c * _CHUNK_ROWS, _CHUNK_ROWS)
        d = (a_ref[pl.ds(r, _CHUNK_ROWS), :].astype(jnp.float32)
             - b_ref[pl.ds(r, _CHUNK_ROWS), :].astype(jnp.float32))
        # (256, 128) -> (32, 8, 128); reduce the leading (vreg-group) axis on
        # the VPU into a single-vreg register-carried accumulator.
        return acc + jnp.sum((d * d).reshape(-1, 8, _LANES), axis=0)

    out_ref[...] += lax.fori_loop(0, n_chunks, body,
                                  jnp.zeros((8, _LANES), jnp.float32))


def _jnp_sq_diff_sum(a, b):
    d = a.astype(jnp.float32) - b.astype(jnp.float32)
    return jnp.sum(d * d)


def transmission_loss(a: jax.Array, b: jax.Array, loss_weight: float = 1.0) -> jax.Array:
    assert a.shape == b.shape, "a and b must have the same shape"
    n_elem = a.size
    ia, ib = a.dtype.itemsize, b.dtype.itemsize
    inv_n_w = jnp.float32(loss_weight / n_elem)

    # Small / awkward inputs: fused XLA reduction (no padding copies, no pallas
    # fixed cost).  Non-128-divisible element counts cannot be viewed as a
    # lane-dense slab without a padding copy, so they also take this path.
    if (n_elem * max(ia, ib) < _SMALL_INPUT_BYTES
            or n_elem % _LANES != 0
            or ia not in (1, 2, 4) or ib not in (1, 2, 4)):
        return _jnp_sq_diff_sum(a, b) * inv_n_w

    splits = _num_core_splits()
    n_rows = n_elem // _LANES
    rows_per_core = n_rows // splits

    # dtype-aware block: ~4 MiB per input, rows a multiple of 256 (=> aligned
    # sublane packing for f32/bf16/int8/fp8).
    max_rows = _TARGET_BLOCK_BYTES // (_LANES * max(ia, ib))
    tile_rows = min(max_rows, (rows_per_core // _CHUNK_ROWS) * _CHUNK_ROWS)
    if tile_rows == 0:
        return _jnp_sq_diff_sum(a, b) * inv_n_w
    n_inner = rows_per_core // tile_rows
    bulk_rows = splits * n_inner * tile_rows
    bulk_elems = bulk_rows * _LANES

    # Free, contiguous reshapes (original dtype, no HBM copy).
    a2 = a.reshape(n_rows, _LANES)
    b2 = b.reshape(n_rows, _LANES)

    # VMEM budget: 2 inputs x 2 pipeline buffers x block + strip temporaries +
    # (8,128) out block; generous margin, still well under v7x's 64 MiB.
    vmem_limit = min(64 << 20, 2 * tile_rows * _LANES * (ia + ib) + (8 << 20))

    in_map = lambda c, i: (c * n_inner + i, 0)

    partials = pl.pallas_call(
        _mse_partial_kernel,
        out_shape=jax.ShapeDtypeStruct((splits * 8, _LANES), jnp.float32),
        grid_spec=pltpu.PrefetchScalarGridSpec(
            num_scalar_prefetch=0,
            grid=(splits, n_inner),
            in_specs=[
                pl.BlockSpec((tile_rows, _LANES), in_map),
                pl.BlockSpec((tile_rows, _LANES), in_map),
            ],
            out_specs=pl.BlockSpec((8, _LANES), lambda c, i: (c, 0)),
        ),
        # TODO(synk): on v7x, verify in a trace that the size-2 "parallel" axis
        # really shards across both TensorCores; if Mosaic serializes it,
        # switch to pltpu.CORE_PARALLEL / pl.core_map.  (Also worth sweeping
        # pipeline_mode=pl.Buffered(3) on the input specs once on hardware.)
        compiler_params=pltpu.CompilerParams(
            dimension_semantics=("parallel", "arbitrary"),
            vmem_limit_bytes=int(vmem_limit),
        ),
        cost_estimate=pl.CostEstimate(
            flops=3 * bulk_elems,
            transcendentals=0,
            bytes_accessed=bulk_elems * (ia + ib) + splits * 8 * _LANES * 4,
        ),
    )(a2, b2)

    total = jnp.sum(partials)

    # Leftover rows that do not fill a whole tile: tiny fused reduction over
    # just those bytes (no second pass over the bulk, unlike the old jnp.pad).
    if bulk_rows < n_rows:
        total = total + _jnp_sq_diff_sum(a2[bulk_rows:], b2[bulk_rows:])

    return total * inv_n_w


if __name__ == "__main__":
    key = jax.random.PRNGKey(0)
    k1, k2, k3, k4, k5, k6, k7, k8 = jax.random.split(key, 8)

    loss_fn = jax.jit(transmission_loss, static_argnames=("loss_weight",))

    def ref_loss(x, y, w):
        d = x.astype(jnp.float32) - y.astype(jnp.float32)
        return jnp.float32(w) * jnp.mean(d * d)

    # 1) Typical transmission-map batch (NCHW, image-sized): Pallas kernel path.
    a1 = jax.random.uniform(k1, (2, 3, 256, 256), dtype=jnp.float32)
    b1 = jax.random.uniform(k2, (2, 3, 256, 256), dtype=jnp.float32)
    out1 = jax.block_until_ready(loss_fn(a1, b1, loss_weight=1.0))
    assert jnp.allclose(out1, ref_loss(a1, b1, 1.0), rtol=1e-5, atol=1e-6), (out1,)

    # 2) Row count not a multiple of the tile: kernel bulk + fused jnp tail.
    a2 = jax.random.uniform(k3, (2, 3, 250, 256), dtype=jnp.float32)
    b2 = jax.random.uniform(k4, (2, 3, 250, 256), dtype=jnp.float32)
    out2 = jax.block_until_ready(loss_fn(a2, b2, loss_weight=0.5))
    assert jnp.allclose(out2, ref_loss(a2, b2, 0.5), rtol=1e-5, atol=1e-6), (out2,)

    # 3) bf16 inputs: dtype-aware tiling, f32 accumulation inside the kernel.
    a3 = jax.random.uniform(k5, (2, 3, 256, 256), dtype=jnp.bfloat16)
    b3 = jax.random.uniform(k6, (2, 3, 256, 256), dtype=jnp.bfloat16)
    out3 = jax.block_until_ready(loss_fn(a3, b3, loss_weight=1.0))
    assert jnp.allclose(out3, ref_loss(a3, b3, 1.0), rtol=1e-4, atol=1e-6), (out3,)

    # 4) Small / awkward shape: fused-XLA fallback (no pad, no pallas fixed cost).
    a4 = jax.random.uniform(k7, (2, 4, 16, 16), dtype=jnp.float32)
    b4 = jax.random.uniform(k8, (2, 4, 16, 16), dtype=jnp.float32)
    out4 = jax.block_until_ready(loss_fn(a4, b4, loss_weight=2.0))
    assert jnp.allclose(out4, ref_loss(a4, b4, 2.0), rtol=1e-5, atol=1e-6), (out4,)

    print("KERNEL_OK")
</pallas_src>

<mosaic_0001>
module attributes {stable_mosaic.version = 11 : i64} {
  func.func @_mse_partial_kernel(%arg0: i32, %arg1: i32, %arg2: memref<3072x128xf32, #tpu.memory_space<vmem>>, %arg3: memref<3072x128xf32, #tpu.memory_space<vmem>>, %arg4: memref<8x128xf32, #tpu.memory_space<vmem>>) attributes {dimension_semantics = [#tpu.dimension_semantics<parallel>, #tpu.dimension_semantics<arbitrary>], iteration_bounds = array<i64: 1, 1>, scalar_prefetch = 0 : i64, scratch_operands = 0 : i64, tpu.core_type = #tpu.core_type<tc>, window_params = [{transform_indices = @transform_0, window_bounds = array<i64: 3072, 128>}, {transform_indices = @transform_1, window_bounds = array<i64: 3072, 128>}, {transform_indices = @transform_2, window_bounds = array<i64: 8, 128>}]} {
    %c0_i32 = arith.constant 0 : i32
    %0 = arith.cmpi eq, %arg1, %c0_i32 : i32
    %1 = arith.extui %0 : i1 to i32
    %c0_i32_0 = arith.constant 0 : i32
    %2 = arith.cmpi ne, %1, %c0_i32_0 : i32
    scf.if %2 {
      %cst_6 = arith.constant 0.000000e+00 : f32
      %9 = vector.broadcast %cst_6 : f32 to vector<8x128xf32>
      %c0_7 = arith.constant 0 : index
      %c0_8 = arith.constant 0 : index
      %10 = vector.load %arg4[%c0_7, %c0_8] : memref<8x128xf32, #tpu.memory_space<vmem>>, vector<8x128xf32>
      tpu.vector_store %arg4[%c0_7, %c0_8], %9 {strides = array<i32>} : memref<8x128xf32, #tpu.memory_space<vmem>>, vector<8x128xf32>,
    } else {
    }
    %c0 = arith.constant 0 : index
    %c0_1 = arith.constant 0 : index
    %3 = vector.load %arg4[%c0, %c0_1] : memref<8x128xf32, #tpu.memory_space<vmem>>, vector<8x128xf32>
    %cst = arith.constant 0.000000e+00 : f32
    %4 = vector.broadcast %cst : f32 to vector<8x128xf32>
    %c0_i32_2 = arith.constant 0 : i32
    %c12_i32 = arith.constant 12 : i32
    %5 = arith.addi %c0_i32_2, %c12_i32 : i32
    %c1_i32 = arith.constant 1 : i32
    %6 = scf.for %arg5 = %c0_i32_2 to %5 step %c1_i32 iter_args(%arg6 = %4) -> (vector<8x128xf32>)  : i32 {
      %c256_i32 = arith.constant 256 : i32
      %9 = arith.muli %arg5, %c256_i32 : i32
      %10 = tpu.assume_multiple %9, 256 : i32
      %11 = arith.index_cast %10 : i32 to index
      %c0_6 = arith.constant 0 : index
      %12 = vector.load %arg2[%11, %c0_6] : memref<3072x128xf32, #tpu.memory_space<vmem>>, vector<256x128xf32>
      %13 = arith.index_cast %10 : i32 to index
      %c0_7 = arith.constant 0 : index
      %14 = vector.load %arg3[%13, %c0_7] : memref<3072x128xf32, #tpu.memory_space<vmem>>, vector<256x128xf32>
      %15 = arith.subf %12, %14 : vector<256x128xf32>
      %16 = arith.mulf %15, %15 : vector<256x128xf32>
      %17 = vector.shape_cast %16 : vector<256x128xf32> to vector<32x8x128xf32>
      %cst_8 = arith.constant dense<0.000000e+00> : vector<8x128xf32>
      %18 = vector.multi_reduction <add>, %17, %cst_8 [0] : vector<32x8x128xf32> to vector<8x128xf32>
      %19 = arith.addf %arg6, %18 : vector<8x128xf32>
      scf.yield %19 : vector<8x128xf32>
    }
    %c12_i32_3 = arith.constant 12 : i32
    %7 = arith.addf %3, %6 : vector<8x128xf32>
    %c0_4 = arith.constant 0 : index
    %c0_5 = arith.constant 0 : index
    %8 = vector.load %arg4[%c0_4, %c0_5] : memref<8x128xf32, #tpu.memory_space<vmem>>, vector<8x128xf32>
    tpu.vector_store %arg4[%c0_4, %c0_5], %7 {strides = array<i32>} : memref<8x128xf32, #tpu.memory_space<vmem>>, vector<8x128xf32>,
    return
  }
  func.func @transform_0(%arg0: i32, %arg1: i32) -> (i32, i32) {
    %c1_i32 = arith.constant 1 : i32
    %0 = arith.muli %arg0, %c1_i32 : i32
    %1 = arith.addi %0, %arg1 : i32
    %c0_i32 = arith.constant 0 : i32
    %c0_i32_0 = arith.constant 0 : i32
    return %1, %c0_i32 : i32, i32
  }
  func.func @transform_1(%arg0: i32, %arg1: i32) -> (i32, i32) {
    %c1_i32 = arith.constant 1 : i32
    %0 = arith.muli %arg0, %c1_i32 : i32
    %1 = arith.addi %0, %arg1 : i32
    %c0_i32 = arith.constant 0 : i32
    %c0_i32_0 = arith.constant 0 : i32
    return %1, %c0_i32 : i32, i32
  }
  func.func @transform_2(%arg0: i32, %arg1: i32) -> (i32, i32) {
    %c0_i32 = arith.constant 0 : i32
    %c0_i32_0 = arith.constant 0 : i32
    return %arg0, %c0_i32 : i32, i32
  }
}

</mosaic_0001>

<bundles_post_ra>
// kernel: transmission_loss.1
= control target key start
LH: loop header
LB: loop body
LE: loop exit
PB: predicated region body
PF: predicated region fallthrough
CT: control target
= control target key end

     0   :  { %v295_v0 = vmov 0.0   ;;  %v314_v1 = vmov 0.0   ;;  %s316_s11 = smov 0   ;;  %s408_s0 = inlined_call_operand.vmem [shape: f32[3072,128], index: 0, kind: input, shape index: {}]   ;;  %s409_s1 = inlined_call_operand.vmem [shape: f32[3072,128], index: 1, kind: input, shape index: {}]   ;;  %s410_s2 = inlined_call_operand.vmem [shape: f32[8,128], index: 2, kind: output, shape index: {}]  }
   0x1   :  { %59 = vst [vmem:[%s410_s2] sm:$0xff] %v295_v0 }
   0x2 LB: > { %s261_s12 = sshll.u32 %s293_s11, 8  ;;  %s66_s11 = sadd.s32 1, %s293_s11   ;;  %s293_s11 = sphi %s316_s11, %s66_s11   ;;  %v289_v1 = vphi %v314_v1, %v411_v1  }
   0x3   : > { %s328_s15 = scalar_lea.vmem %s408_s0, %s261_s12  ;;  %s333_s18 = scalar_lea.vmem %s409_s1, %s261_s12 }
   0x4   : > { %v70_v2 = vld [vmem:[%s328_s15] sm:$0xff]  ;;  %v71_v3 = vld [vmem:[%s328_s15 + $0x8] sm:$0xff]  ;;  %v72_v6 = vld [vmem:[%s328_s15 + $0x10] sm:$0xff]  ;;  %p63_p0 = scmp.ge.s32.totalorder %s66_s11, 12  }
   0x5   : > { %v103_v4 = vld [vmem:[%s333_s18] sm:$0xff]  ;;  %v104_v5 = vld [vmem:[%s333_s18 + $0x8] sm:$0xff]  ;;  %v105_v7 = vld [vmem:[%s333_s18 + $0x10] sm:$0xff] }
   0x6   : > { %v135_v8 = vsub.f32 %v70_v2, %v103_v4  ;;  %v136_v9 = vsub.f32 %v71_v3, %v104_v5  ;;  %v73_v10 = vld [vmem:[%s328_s15 + $0x18] sm:$0xff]  ;;  %v137_v12 = vsub.f32 %v72_v6, %v105_v7  ;;  %v74_v13 = vld [vmem:[%s328_s15 + $0x20] sm:$0xff]  ;;  %v75_v18 = vld [vmem:[%s328_s15 + $0x28] sm:$0xff] }
   0x7   : > { %v106_v11 = vld [vmem:[%s333_s18 + $0x18] sm:$0xff]  ;;  %v107_v14 = vld [vmem:[%s333_s18 + $0x20] sm:$0xff]  ;;  %v108_v19 = vld [vmem:[%s333_s18 + $0x28] sm:$0xff] }
   0x8   : > { %v138_v15 = vsub.f32 %v73_v10, %v106_v11  ;;  %v167_v16 = vmul.f32 %v135_v8, %v135_v8  ;;  %v168_v17 = vmul.f32 %v136_v9, %v136_v9  ;;  %v139_v20 = vsub.f32 %v74_v13, %v107_v14  ;;  %v76_v22 = vld [vmem:[%s328_s15 + $0x30] sm:$0xff]  ;;  %v77_v27 = vld [vmem:[%s328_s15 + $0x38] sm:$0xff]  ;;  %v78_v32 = vld [vmem:[%s328_s15 + $0x40] sm:$0xff] }
   0x9   : > { %v169_v21 = vmul.f32 %v137_v12, %v137_v12  ;;  %v109_v23 = vld [vmem:[%s333_s18 + $0x30] sm:$0xff]  ;;  %v140_v24 = vsub.f32 %v75_v18, %v108_v19  ;;  %v110_v28 = vld [vmem:[%s333_s18 + $0x38] sm:$0xff]  ;;  %v111_v33 = vld [vmem:[%s333_s18 + $0x40] sm:$0xff] }
   0xa   : > { %v170_v25 = vmul.f32 %v138_v15, %v138_v15  ;;  %v199_v26 = vadd.f32 %v168_v17, %v167_v16  ;;  %v141_v29 = vsub.f32 %v76_v22, %v109_v23  ;;  %v171_v30 = vmul.f32 %v139_v20, %v139_v20  ;;  %v79_v37 = vld [vmem:[%s328_s15 + $0x48] sm:$0xff]  ;;  %v80_v42 = vld [vmem:[%s328_s15 + $0x50] sm:$0xff]  ;;  %v81_v47 = vld [vmem:[%s328_s15 + $0x58] sm:$0xff] }
   0xb   : > { %v142_v34 = vsub.f32 %v77_v27, %v110_v28  ;;  %v172_v35 = vmul.f32 %v140_v24, %v140_v24  ;;  %v112_v38 = vld [vmem:[%s333_s18 + $0x48] sm:$0xff]  ;;  %v143_v39 = vsub.f32 %v78_v32, %v111_v33  ;;  %v113_v43 = vld [vmem:[%s333_s18 + $0x50] sm:$0xff]  ;;  %v114_v48 = vld [vmem:[%s333_s18 + $0x58] sm:$0xff] }
   0xc   : > { %v200_v31 = vadd.f32 %v199_v26, %v169_v21  ;;  %v173_v40 = vmul.f32 %v141_v29, %v141_v29  ;;  %v144_v44 = vsub.f32 %v79_v37, %v112_v38  ;;  %v145_v49 = vsub.f32 %v80_v42, %v113_v43  ;;  %v82_v52 = vld [vmem:[%s328_s15 + $0x60] sm:$0xff]  ;;  %v83_v57 = vld [vmem:[%s328_s15 + $0x68] sm:$0xff]  ;;  %v84_v62 = vld [vmem:[%s328_s15 + $0x70] sm:$0xff] }
   0xd   : > { %v174_v45 = vmul.f32 %v142_v34, %v142_v34  ;;  %v175_v50 = vmul.f32 %v143_v39, %v143_v39  ;;  %v115_v53 = vld [vmem:[%s333_s18 + $0x60] sm:$0xff]  ;;  %v146_v54 = vsub.f32 %v81_v47, %v114_v48  ;;  %v116_v58 = vld [vmem:[%s333_s18 + $0x68] sm:$0xff]  ;;  %v117_v63 = vld [vmem:[%s333_s18 + $0x70] sm:$0xff] }
   0xe   : > { %v201_v36 = vadd.f32 %v200_v31, %v170_v25  ;;  %v176_v55 = vmul.f32 %v144_v44, %v144_v44  ;;  %v147_v59 = vsub.f32 %v82_v52, %v115_v53  ;;  %v177_v60 = vmul.f32 %v145_v49, %v145_v49  ;;  %v85_v4 = vld [vmem:[%s328_s15 + $0x78] sm:$0xff]  ;;  %v86_v9 = vld [vmem:[%s328_s15 + $0x80] sm:$0xff]  ;;  %v87_v14 = vld [vmem:[%s328_s15 + $0x88] sm:$0xff] }
   0xf   : > { %v148_v0 = vsub.f32 %v83_v57, %v116_v58  ;;  %v178_v2 = vmul.f32 %v146_v54, %v146_v54  ;;  %v118_v5 = vld [vmem:[%s333_s18 + $0x78] sm:$0xff]  ;;  %v149_v6 = vsub.f32 %v84_v62, %v117_v63  ;;  %v119_v10 = vld [vmem:[%s333_s18 + $0x80] sm:$0xff]  ;;  %v120_v15 = vld [vmem:[%s333_s18 + $0x88] sm:$0xff] }
  0x10   : > { %v202_v41 = vadd.f32 %v201_v36, %v171_v30  ;;  %v179_v7 = vmul.f32 %v147_v59, %v147_v59  ;;  %v150_v11 = vsub.f32 %v85_v4, %v118_v5  ;;  %v151_v16 = vsub.f32 %v86_v9, %v119_v10  ;;  %v88_v19 = vld [vmem:[%s328_s15 + $0x90] sm:$0xff]  ;;  %v89_v24 = vld [vmem:[%s328_s15 + $0x98] sm:$0xff]  ;;  %v90_v29 = vld [vmem:[%s328_s15 + $0xa0] sm:$0xff] }
  0x11   : > { %v180_v12 = vmul.f32 %v148_v0, %v148_v0  ;;  %v181_v17 = vmul.f32 %v149_v6, %v149_v6  ;;  %v121_v20 = vld [vmem:[%s333_s18 + $0x90] sm:$0xff]  ;;  %v152_v21 = vsub.f32 %v87_v14, %v120_v15  ;;  %v122_v25 = vld [vmem:[%s333_s18 + $0x98] sm:$0xff]  ;;  %v123_v30 = vld [vmem:[%s333_s18 + $0xa0] sm:$0xff] }
  0x12   : > { %v203_v46 = vadd.f32 %v202_v41, %v172_v35  ;;  %v182_v22 = vmul.f32 %v150_v11, %v150_v11  ;;  %v153_v26 = vsub.f32 %v88_v19, %v121_v20  ;;  %v183_v27 = vmul.f32 %v151_v16, %v151_v16  ;;  %v91_v34 = vld [vmem:[%s328_s15 + $0xa8] sm:$0xff]  ;;  %v92_v39 = vld [vmem:[%s328_s15 + $0xb0] sm:$0xff]  ;;  %v93_v44 = vld [vmem:[%s328_s15 + $0xb8] sm:$0xff] }
  0x13   : > { %v154_v31 = vsub.f32 %v89_v24, %v122_v25  ;;  %v184_v32 = vmul.f32 %v152_v21, %v152_v21  ;;  %v124_v35 = vld [vmem:[%s333_s18 + $0xa8] sm:$0xff]  ;;  %v155_v36 = vsub.f32 %v90_v29, %v123_v30  ;;  %v94_v49 = vld [vmem:[%s328_s15 + $0xc0] sm:$0xff]  ;;  %v96_v59 = vld [vmem:[%s328_s15 + $0xd0] sm:$0xff] }
  0x14   : > { %v204_v51 = vadd.f32 %v203_v46, %v173_v40  ;;  %v185_v37 = vmul.f32 %v153_v26, %v153_v26  ;;  %v125_v40 = vld [vmem:[%s333_s18 + $0xb0] sm:$0xff]  ;;  %v156_v41 = vsub.f32 %v91_v34, %v124_v35  ;;  %v95_v54 = vld [vmem:[%s328_s15 + $0xc8] sm:$0xff]  ;;  %v97_v0 = vld [vmem:[%s328_s15 + $0xd8] sm:$0xff] }
  0x15   : > { %v186_v42 = vmul.f32 %v154_v31, %v154_v31  ;;  %v157_v46 = vsub.f32 %v92_v39, %v125_v40  ;;  %v187_v47 = vmul.f32 %v155_v36, %v155_v36  ;;  %v98_v6 = vld [vmem:[%s328_s15 + $0xe0] sm:$0xff]  ;;  %v99_v11 = vld [vmem:[%s328_s15 + $0xe8] sm:$0xff]  ;;  %v100_v16 = vld [vmem:[%s328_s15 + $0xf0] sm:$0xff] }
  0x16   : > { %v205_v56 = vadd.f32 %v204_v51, %v174_v45  ;;  %v126_v45 = vld [vmem:[%s333_s18 + $0xb8] sm:$0xff]  ;;  %v188_v52 = vmul.f32 %v156_v41, %v156_v41 }
  0x17   : > { %v158_v51 = vsub.f32 %v93_v44, %v126_v45  ;;  %v189_v57 = vmul.f32 %v157_v46, %v157_v46  ;;  %v101_v21 = vld [vmem:[%s328_s15 + $0xf8] sm:$0xff] }
  0x18   : > { %v206_v61 = vadd.f32 %v205_v56, %v175_v50  ;;  %v127_v50 = vld [vmem:[%s333_s18 + $0xc0] sm:$0xff] }
  0x19   : > { %v159_v56 = vsub.f32 %v94_v49, %v127_v50  ;;  %v190_v62 = vmul.f32 %v158_v51, %v158_v51 }
  0x1a   : > { %v207_v3 = vadd.f32 %v206_v61, %v176_v55  ;;  %v128_v55 = vld [vmem:[%s333_s18 + $0xc8] sm:$0xff] }
  0x1b   : > { %v160_v61 = vsub.f32 %v95_v54, %v128_v55  ;;  %v191_v4 = vmul.f32 %v159_v56, %v159_v56 }
  0x1c   : > { %v208_v8 = vadd.f32 %v207_v3, %v177_v60  ;;  %v129_v60 = vld [vmem:[%s333_s18 + $0xd0] sm:$0xff] }
  0x1d   : > { %v161_v3 = vsub.f32 %v96_v59, %v129_v60  ;;  %v192_v9 = vmul.f32 %v160_v61, %v160_v61 }
  0x1e   : > { %v209_v13 = vadd.f32 %v208_v8, %v178_v2  ;;  %v130_v2 = vld [vmem:[%s333_s18 + $0xd8] sm:$0xff] }
  0x1f   : > { %v162_v8 = vsub.f32 %v97_v0, %v130_v2  ;;  %v193_v14 = vmul.f32 %v161_v3, %v161_v3 }
  0x20   : > { %v210_v18 = vadd.f32 %v209_v13, %v179_v7  ;;  %v131_v7 = vld [vmem:[%s333_s18 + $0xe0] sm:$0xff] }
  0x21   : > { %v163_v13 = vsub.f32 %v98_v6, %v131_v7  ;;  %v194_v19 = vmul.f32 %v162_v8, %v162_v8 }
  0x22   : > { %v211_v23 = vadd.f32 %v210_v18, %v180_v12  ;;  %v132_v12 = vld [vmem:[%s333_s18 + $0xe8] sm:$0xff] }
  0x23   : > { %v164_v18 = vsub.f32 %v99_v11, %v132_v12  ;;  %v195_v24 = vmul.f32 %v163_v13, %v163_v13 }
  0x24   : > { %v212_v28 = vadd.f32 %v211_v23, %v181_v17  ;;  %v133_v17 = vld [vmem:[%s333_s18 + $0xf0] sm:$0xff] }
  0x25   : > { %v165_v23 = vsub.f32 %v100_v16, %v133_v17 }
  0x26   : > { %v213_v33 = vadd.f32 %v212_v28, %v182_v22  ;;  %v134_v22 = vld [vmem:[%s333_s18 + $0xf8] sm:$0xff] }
  0x27   : > { %v166_v26 = vsub.f32 %v101_v21, %v134_v22  ;;  %v197_v29 = vmul.f32 %v165_v23, %v165_v23 }
  0x28   : > { %v214_v38 = vadd.f32 %v213_v33, %v183_v27  ;;  %v196_v27 = vmul.f32 %v164_v18, %v164_v18 }
  0x29   : > { %v198_v31 = vmul.f32 %v166_v26, %v166_v26 }
  0x2a   : > { %v215_v43 = vadd.f32 %v214_v38, %v184_v32 }
  0x2c   : > { %v216_v48 = vadd.f32 %v215_v43, %v185_v37 }
  0x2e   : > { %v217_v53 = vadd.f32 %v216_v48, %v186_v42 }
  0x30   : > { %v218_v58 = vadd.f32 %v217_v53, %v187_v47 }
  0x32   : > { %v219_v63 = vadd.f32 %v218_v58, %v188_v52 }
  0x34   : > { %v220_v5 = vadd.f32 %v219_v63, %v189_v57 }
  0x36   : > { %v221_v10 = vadd.f32 %v220_v5, %v190_v62 }
  0x38   : > { %v222_v15 = vadd.f32 %v221_v10, %v191_v4 }
  0x3a   : > { %v223_v20 = vadd.f32 %v222_v15, %v192_v9 }
  0x3c   : > { %v224_v25 = vadd.f32 %v223_v20, %v193_v14 }
  0x3e   : > { %v225_v28 = vadd.f32 %v224_v25, %v194_v19 }
  0x40   : > { %v226_v30 = vadd.f32 %v225_v28, %v195_v24 }
  0x42   : > { %v227_v32 = vadd.f32 %v226_v30, %v196_v27 }
  0x44   : > { %v228_v33 = vadd.f32 %v227_v32, %v197_v29 }
  0x46   : > { %v229_v34 = vadd.f32 %v228_v33, %v198_v31  ;;  %65 = sbr.rel (!%p63_p0) target bundleno = 2 (0x2), region = 47 }
  0x48   : > { %v230_v35 = vadd.f32 %v289_v1, %v229_v34  }
  0x4a   : > { %v411_v1 = vmov %v230_v35  ;;  %232 = vst [vmem:[%s410_s2] sm:$0xff] (%p63_p0), %v230_v35 }

</bundles_post_ra>
